<compile_context>
chip_gen: v6e
topology: v6e:2x2x1
jax: 0.10.0
libtpu: 0.0.40
codegen_flags: <defaults>
</compile_context>

<pallas_src>
import functools

import jax
import jax.numpy as jnp
from jax.experimental import pallas as pl
from jax.experimental.pallas import tpu as pltpu

NEGATIVE_SLOPE = 1.0      # matches `negative_slope = 1` in the PyTorch spec
IN_FEATURES = 3
OUT_FEATURES = 8
LANE = 128


def _linear_leaky_kernel(w_ref, b_ref, x_ref, o_ref, *, negative_slope):
    # w_ref: (8, 3) VMEM-resident, b_ref: (8, 1), x_ref: (3, tl), o_ref: (8, tl)
    w = w_ref[...]                      # (8, 3)
    b = b_ref[...]                      # (8, 1)
    x = x_ref[...]                      # (3, tl)  batch on lanes

    # out[n, m] = sum_k W[n, k] * x[k, m] + b[n]  -- three VPU broadcast FMAs.
    acc = b + w[:, 0:1] * x[0:1, :]
    acc = acc + w[:, 1:2] * x[1:2, :]
    acc = acc + w[:, 2:3] * x[2:3, :]

    if negative_slope != 1.0:
        # leaky-ReLU select; with slope == 1.0 it is the identity -> skipped.
        acc = jnp.where(acc > 0, acc, acc * negative_slope)

    o_ref[...] = acc


def _choose_lane_tile(m, *, max_tile=65536, min_grid=4):
    """Lane tile: multiple of 128, scaled with M so each grid step moves
    enough bytes to amortize the ~0.35 us step overhead, but capped so the
    grid keeps >= min_grid steps (>= 2 per TC on v7x for megacore sharding
    and double-buffering)."""
    m_lanes = pl.cdiv(max(m, 1), LANE) * LANE
    target = pl.cdiv(pl.cdiv(m_lanes, min_grid), LANE) * LANE
    return max(LANE, min(max_tile, target))


def linear_leaky(x, weight, bias, *, negative_slope=NEGATIVE_SLOPE,
                 max_tile=65536, feature_major_output=False):
    """x: (M, 3), weight: (8, 3) (PyTorch layout), bias: (8,).

    Returns leaky_relu(x @ weight.T + bias, negative_slope):
      (M, 8) by default (PyTorch layout), or (8, M) lane-dense if
      feature_major_output=True (skips the wrapper relayout entirely).
    """
    M = x.shape[0]
    tl = _choose_lane_tile(M, max_tile=max_tile)
    grid_m = pl.cdiv(M, tl)

    # Lane-dense input: batch on the last (lane) axis. No padding pass; the
    # partial last block (if any) is handled by Pallas.
    x_t = x.astype(jnp.float32).T                              # (3, M)
    w = weight.astype(jnp.float32)                             # (8, 3)
    b2 = bias.astype(jnp.float32).reshape(OUT_FEATURES, 1)     # (8, 1)

    kernel = functools.partial(_linear_leaky_kernel,
                               negative_slope=negative_slope)

    out_t = pl.pallas_call(
        kernel,
        out_shape=jax.ShapeDtypeStruct((OUT_FEATURES, M), jnp.float32),
        grid_spec=pltpu.PrefetchScalarGridSpec(
            num_scalar_prefetch=0,
            grid=(grid_m,),
            in_specs=[
                # Tiny weight / bias blocks: VMEM-resident, reused every step.
                pl.BlockSpec((OUT_FEATURES, IN_FEATURES), lambda i: (0, 0)),
                pl.BlockSpec((OUT_FEATURES, 1), lambda i: (0, 0)),
                # x: tiled along the lane-dense batch axis (pipelined DMA).
                pl.BlockSpec((IN_FEATURES, tl), lambda i: (0, i)),
            ],
            out_specs=pl.BlockSpec((OUT_FEATURES, tl), lambda i: (0, i)),
        ),
        compiler_params=pltpu.CompilerParams(
            dimension_semantics=("parallel",)),   # shards over v7x's 2 TCs
    )(w, b2, x_t)

    if feature_major_output:
        return out_t                 # (8, M), no extra HBM pass
    return out_t.T                   # PyTorch layout (M, 8)


if __name__ == "__main__":
    key = jax.random.PRNGKey(0)
    kx, kw, kb = jax.random.split(key, 3)

    # Deterministic synthetic parameters (nn.Linear-style init bounds).
    bound = 1.0 / (IN_FEATURES ** 0.5)
    weight = jax.random.uniform(
        kw, (OUT_FEATURES, IN_FEATURES), jnp.float32, -bound, bound)
    bias = jax.random.uniform(kb, (OUT_FEATURES,), jnp.float32, -bound, bound)

    # Spec-sized input: x1 = torch.randn(1, 3)
    x1 = jax.random.normal(kx, (1, IN_FEATURES), jnp.float32)

    out = jax.block_until_ready(linear_leaky(x1, weight, bias))

    # Reference in plain JAX (leaky-ReLU with slope 1.0 == identity).
    v1 = x1 @ weight.T + bias
    ref = jnp.where(v1 > 0, v1, v1 * NEGATIVE_SLOPE)
    assert out.shape == (1, OUT_FEATURES)
    assert jnp.allclose(out, ref, atol=1e-5, rtol=1e-5), "mismatch vs reference"

    # Non-multiple-of-128 batch exercises the partial-last-block (no-pad) path.
    x2 = jax.random.normal(kx, (300, IN_FEATURES), jnp.float32)
    out2 = jax.block_until_ready(linear_leaky(x2, weight, bias))
    v1b = x2 @ weight.T + bias
    ref2 = jnp.where(v1b > 0, v1b, v1b * NEGATIVE_SLOPE)
    assert jnp.allclose(out2, ref2, atol=1e-5, rtol=1e-5), "mismatch (partial block)"

    # Relayout-free feature-major path (consumer absorbs the transpose).
    out3 = jax.block_until_ready(
        linear_leaky(x2, weight, bias, feature_major_output=True))
    assert out3.shape == (OUT_FEATURES, 300)
    assert jnp.allclose(out3.T, ref2, atol=1e-5, rtol=1e-5), "mismatch (feature-major)"

    print("KERNEL_OK")
</pallas_src>

<mosaic_0001>
module attributes {stable_mosaic.version = 11 : i64} {
  func.func @_linear_leaky_kernel(%arg0: i32, %arg1: memref<8x3xf32, #tpu.memory_space<vmem>>, %arg2: memref<8x1xf32, #tpu.memory_space<vmem>>, %arg3: memref<3x128xf32, #tpu.memory_space<vmem>>, %arg4: memref<8x128xf32, #tpu.memory_space<vmem>>) attributes {dimension_semantics = [#tpu.dimension_semantics<parallel>], iteration_bounds = array<i64: 1>, scalar_prefetch = 0 : i64, scratch_operands = 0 : i64, tpu.core_type = #tpu.core_type<tc>, window_params = [{pipeline_mode = #tpu.pipeline_mode<synchronous>, transform_indices = @transform_0, window_bounds = array<i64: 8, 3>}, {pipeline_mode = #tpu.pipeline_mode<synchronous>, transform_indices = @transform_1, window_bounds = array<i64: 8, 1>}, {transform_indices = @transform_2, window_bounds = array<i64: 3, 128>}, {transform_indices = @transform_3, window_bounds = array<i64: 8, 128>}]} {
    %c0 = arith.constant 0 : index
    %c0_0 = arith.constant 0 : index
    %0 = vector.load %arg1[%c0, %c0_0] : memref<8x3xf32, #tpu.memory_space<vmem>>, vector<8x3xf32>
    %c0_1 = arith.constant 0 : index
    %c0_2 = arith.constant 0 : index
    %1 = vector.load %arg2[%c0_1, %c0_2] : memref<8x1xf32, #tpu.memory_space<vmem>>, vector<8x1xf32>
    %c0_3 = arith.constant 0 : index
    %c0_4 = arith.constant 0 : index
    %2 = vector.load %arg3[%c0_3, %c0_4] : memref<3x128xf32, #tpu.memory_space<vmem>>, vector<3x128xf32>
    %3 = vector.extract_strided_slice %0 {offsets = [0, 0], sizes = [8, 1], strides = [1, 1]} : vector<8x3xf32> to vector<8x1xf32>
    %4 = vector.extract_strided_slice %2 {offsets = [0, 0], sizes = [1, 128], strides = [1, 1]} : vector<3x128xf32> to vector<1x128xf32>
    %5 = vector.broadcast %3 : vector<8x1xf32> to vector<8x128xf32>
    %6 = vector.broadcast %4 : vector<1x128xf32> to vector<8x128xf32>
    %7 = arith.mulf %5, %6 : vector<8x128xf32>
    %8 = vector.broadcast %1 : vector<8x1xf32> to vector<8x128xf32>
    %9 = arith.addf %8, %7 : vector<8x128xf32>
    %10 = vector.extract_strided_slice %0 {offsets = [0, 1], sizes = [8, 1], strides = [1, 1]} : vector<8x3xf32> to vector<8x1xf32>
    %11 = vector.extract_strided_slice %2 {offsets = [1, 0], sizes = [1, 128], strides = [1, 1]} : vector<3x128xf32> to vector<1x128xf32>
    %12 = vector.broadcast %10 : vector<8x1xf32> to vector<8x128xf32>
    %13 = vector.broadcast %11 : vector<1x128xf32> to vector<8x128xf32>
    %14 = arith.mulf %12, %13 : vector<8x128xf32>
    %15 = arith.addf %9, %14 : vector<8x128xf32>
    %16 = vector.extract_strided_slice %0 {offsets = [0, 2], sizes = [8, 1], strides = [1, 1]} : vector<8x3xf32> to vector<8x1xf32>
    %17 = vector.extract_strided_slice %2 {offsets = [2, 0], sizes = [1, 128], strides = [1, 1]} : vector<3x128xf32> to vector<1x128xf32>
    %18 = vector.broadcast %16 : vector<8x1xf32> to vector<8x128xf32>
    %19 = vector.broadcast %17 : vector<1x128xf32> to vector<8x128xf32>
    %20 = arith.mulf %18, %19 : vector<8x128xf32>
    %21 = arith.addf %15, %20 : vector<8x128xf32>
    %c0_5 = arith.constant 0 : index
    %c0_6 = arith.constant 0 : index
    %22 = vector.load %arg4[%c0_5, %c0_6] : memref<8x128xf32, #tpu.memory_space<vmem>>, vector<8x128xf32>
    tpu.vector_store %arg4[%c0_5, %c0_6], %21 {strides = array<i32>} : memref<8x128xf32, #tpu.memory_space<vmem>>, vector<8x128xf32>,
    return
  }
  func.func @transform_0(%arg0: i32) -> (i32, i32) {
    %c0_i32 = arith.constant 0 : i32
    %c0_i32_0 = arith.constant 0 : i32
    %c0_i32_1 = arith.constant 0 : i32
    return %c0_i32, %c0_i32_0 : i32, i32
  }
  func.func @transform_1(%arg0: i32) -> (i32, i32) {
    %c0_i32 = arith.constant 0 : i32
    %c0_i32_0 = arith.constant 0 : i32
    %c0_i32_1 = arith.constant 0 : i32
    return %c0_i32, %c0_i32_0 : i32, i32
  }
  func.func @transform_2(%arg0: i32) -> (i32, i32) {
    %c0_i32 = arith.constant 0 : i32
    %c0_i32_0 = arith.constant 0 : i32
    return %c0_i32, %arg0 : i32, i32
  }
  func.func @transform_3(%arg0: i32) -> (i32, i32) {
    %c0_i32 = arith.constant 0 : i32
    %c0_i32_0 = arith.constant 0 : i32
    return %c0_i32, %arg0 : i32, i32
  }
}

</mosaic_0001>

<bundles_post_ra>
// kernel: tpu_custom_call.1
= control target key start
LH: loop header
LB: loop body
LE: loop exit
PB: predicated region body
PF: predicated region fallthrough
CT: control target
= control target key end

     0   :  { %v65_v0 = vmov 0   ;;  %v66_v1 = vmov 1   ;;  %v67_v4 = vmov 2   ;;  %v22_v5 = vlaneseq  ;;  %s100_s0 = inlined_call_operand.vmem [shape: f32[8,3], index: 0, kind: input, shape index: {}]   ;;  %s101_s1 = inlined_call_operand.vmem [shape: f32[8,1], index: 1, kind: input, shape index: {}]   ;;  %s102_s2 = inlined_call_operand.vmem [shape: f32[3,1], index: 2, kind: input, shape index: {}]   ;;  %s103_s3 = inlined_call_operand.vmem [shape: f32[8,1], index: 3, kind: output, shape index: {}]  }
   0x1   :  { %61 = vset.pattern.permute.xlu0 %v65_v0  ;;  %62 = vset.pattern.permute.xlu1 %v66_v1  ;;  %v14_v2 = vld [vmem:[%s100_s0] sm:$0xff] }
   0x2   :  { %19 = vperm.xlu0 %61, %v14_v2   ;;  %34 = vperm.xlu1 %62, %v14_v2   ;;  %v15_v3 = vld [vmem:[%s101_s1] sm:$0xff]  ;;  %v23_v6 = vshrl.u32 %v22_v5, 7 }
   0x3   :  { %v16_v8 = vld [vmem:[%s102_s2] sm:$0x7] }
   0x4   :  { %v24_v7 = vsub.s32 0, %v23_v6  ;;  %v39_v9 = vsub.s32 1, %v23_v6  ;;  %v49_v10 = vsub.s32 2, %v23_v6 }
   0x6   :  { %29 = vperm.xlu0 %61, %v15_v3   ;;  %63 = vset.pattern.permute.xlu1 %v67_v4  ;;  %v25_v11 = vrot.slane %v16_v8, %v24_v7  ;;  %v40_v14 = vrot.slane %v16_v8, %v39_v9  ;;  %v50_v15 = vrot.slane %v16_v8, %v49_v10 }
   0x7   :  { %44 = vperm.xlu1 %63, %v14_v2  }
   0xa   :  { %64 = vset.pattern.permute.xlu0 %v67_v4 }
  0x7d   :  { %v20_v12 = vpop.permute.xlu0 %19  ;;  %v35_v13 = vpop.permute.xlu1 %34 }
  0x7e   :  { %v26_v16 = vmul.f32 %v25_v11, %v20_v12  ;;  %v41_v18 = vmul.f32 %v40_v14, %v35_v13 }
  0x81   :  { %v30_v17 = vpop.permute.xlu0 %29 }
  0x82   :  { %v32_v19 = vadd.f32 %v30_v17, %v26_v16  ;;  %v45_v20 = vpop.permute.xlu1 %44 }
  0x83   :  { %v51_v21 = vmul.f32 %v50_v15, %v45_v20 }
  0x84   :  { %v42_v22 = vadd.f32 %v41_v18, %v32_v19 }
  0x86   :  { %v52_v23 = vadd.f32 %v51_v21, %v42_v22 }
  0x88   :  { %53 = vst [vmem:[%s103_s3] sm:$0xff] %v52_v23 }

</bundles_post_ra>
